<compile_context>
chip_gen: v7x
topology: tpu7x:2x2x1
jax: 0.10.0
libtpu: 0.0.40
codegen_flags: <defaults>
</compile_context>

<pallas_src>
import functools

import jax
import jax.numpy as jnp
from jax import lax
from jax.experimental import pallas as pl
from jax.experimental.pallas import tpu as pltpu


def _round_up(x, m):
    return ((x + m - 1) // m) * m


def _smooth_ce_kernel(n_valid_ref, logits_ref, tgt_ref, out_ref,
                      m_ref, s_ref, hit_ref, sumx_ref,
                      *, alpha, num_classes, tc):
    """Row tile (tb, tc) of logits; online logsumexp across the class grid axis."""
    i = pl.program_id(0)            # row-tile index   ("parallel")
    k = pl.program_id(1)            # class-tile index ("arbitrary", reduction)
    nk = pl.num_programs(1)

    @pl.when(k == 0)
    def _():
        m_ref[...] = jnp.full(m_ref.shape, -jnp.inf, jnp.float32)
        s_ref[...] = jnp.zeros(s_ref.shape, jnp.float32)
        hit_ref[...] = jnp.zeros(hit_ref.shape, jnp.float32)
        sumx_ref[...] = jnp.zeros(sumx_ref.shape, jnp.float32)

    x = logits_ref[...].astype(jnp.float32)            # (tb, tc), cast on VPU
    tb = x.shape[0]
    tgt = tgt_ref[...]                                  # (tb, 1) int32

    # Global class index of each lane; mask columns past C (ragged last tile).
    col = k * tc + lax.broadcasted_iota(jnp.int32, (tb, tc), 1)
    valid = col < num_classes

    # Online (streaming) logsumexp.
    m_old = m_ref[...]
    m_new = jnp.maximum(m_old, jnp.max(jnp.where(valid, x, -jnp.inf),
                                       axis=-1, keepdims=True))
    p = jnp.where(valid, jnp.exp(x - m_new), 0.0)
    s_ref[...] = s_ref[...] * jnp.exp(m_old - m_new) + jnp.sum(p, axis=-1,
                                                               keepdims=True)
    m_ref[...] = m_new

    # Target logit (one-hot hit, no gather) and plain logit sum (uniform term).
    hit_ref[...] += jnp.sum(jnp.where(col == tgt, x, 0.0), axis=-1, keepdims=True)
    sumx_ref[...] += jnp.sum(jnp.where(valid, x, 0.0), axis=-1, keepdims=True)

    @pl.when(k == nk - 1)
    def _():
        lse = m_ref[...] + jnp.log(s_ref[...])
        c_f = jnp.float32(num_classes)
        per_row = -((1.0 - alpha) * (hit_ref[...] - lse)
                    + (alpha / c_f) * (sumx_ref[...] - c_f * lse))
        # Zero padded rows (select, not multiply, so NaN/Inf cannot leak).
        row = i * tb + lax.broadcasted_iota(jnp.int32, (tb, 1), 0)
        out_ref[...] = jnp.where(row < n_valid_ref[0], per_row, 0.0)


def _choose_tiles(n, c, itemsize, block_rows=None, block_classes=None):
    # Sublane multiple for packed dtypes (f32 -> 8, bf16/f16 -> 16).
    sub = 8 if itemsize >= 4 else (16 if itemsize == 2 else 32)
    # Class tile: full C for modest vocabularies, else lane-dense 2048 slices.
    if block_classes is not None and block_classes < c:
        tc = max(128, (block_classes // 128) * 128)
    else:
        tc = c if c <= 8192 else 2048
    # Row tile from an ~8 MiB per-buffer logits budget (Pallas double-buffers).
    budget = 8 * 1024 * 1024
    tb = budget // max(tc * itemsize, 1)
    tb = max(sub, min(1024, (tb // sub) * sub))
    if block_rows is not None:
        tb = max(sub, min(tb, _round_up(block_rows, sub)))
    tb = min(tb, _round_up(n, sub))
    # Keep >= 2 row-grid steps when possible (v7x has 2 TensorCores / chip).
    if n > sub and pl.cdiv(n, tb) < 2:
        tb = max(sub, _round_up(pl.cdiv(n, 2), sub))
    return tb, tc


def _vmem_limit_bytes(tb, tc, itemsize):
    try:
        cap = pltpu.get_tpu_info().vmem_capacity_bytes
    except Exception:
        cap = 128 * 1024 * 1024
    # v7x (64 MiB physical) gets a tighter cap than v5e/v6e (128 MiB).
    hard_cap = (28 << 20) if cap <= (96 << 20) else (48 << 20)
    logits_block = tb * tc * itemsize
    small_block = tb * 128 * 4          # (tb,1) blocks are lane-padded to 128
    est = (2 * logits_block            # double-buffered logits tiles
           + 4 * small_block           # tgt + out, double-buffered
           + 4 * small_block           # four (tb,1) f32 scratch accumulators
           + (2 << 20))                # compiler slack
    return int(min(max(est, 8 << 20), hard_cap))


def smooth_cross_entropy_loss(output, target, alpha=0.1,
                              block_rows=None, block_classes=None):
    """output: (N, C) float logits, target: (N,) int class ids -> scalar f32 loss."""
    n, c = output.shape

    logits = output
    if logits.dtype not in (jnp.float32, jnp.bfloat16, jnp.float16):
        logits = logits.astype(jnp.float32)     # stream native 16/32-bit dtypes
    itemsize = jnp.dtype(logits.dtype).itemsize
    tgt2d = target.astype(jnp.int32).reshape(n, 1)
    n_valid = jnp.full((1,), n, dtype=jnp.int32)     # SMEM scalar (prefetched)

    tb, tc = _choose_tiles(n, c, itemsize, block_rows, block_classes)
    grid = (pl.cdiv(n, tb), pl.cdiv(c, tc))

    kernel = functools.partial(_smooth_ce_kernel, alpha=float(alpha),
                               num_classes=c, tc=tc)

    row_losses = pl.pallas_call(
        kernel,
        out_shape=jax.ShapeDtypeStruct((n, 1), jnp.float32),
        grid_spec=pltpu.PrefetchScalarGridSpec(
            num_scalar_prefetch=1,
            grid=grid,
            in_specs=[
                pl.BlockSpec((tb, tc), lambda i, k, nv: (i, k)),   # logits tile
                pl.BlockSpec((tb, 1), lambda i, k, nv: (i, 0)),    # target tile
            ],
            out_specs=pl.BlockSpec((tb, 1), lambda i, k, nv: (i, 0)),
            scratch_shapes=[pltpu.VMEM((tb, 1), jnp.float32)] * 4,  # m, s, hit, sumx
        ),
        compiler_params=pltpu.CompilerParams(
            dimension_semantics=("parallel", "arbitrary"),
            vmem_limit_bytes=_vmem_limit_bytes(tb, tc, itemsize),
        ),
        cost_estimate=pl.CostEstimate(
            flops=8 * n * c,
            transcendentals=n * c,
            bytes_accessed=n * c * itemsize + 2 * n * 4,
        ),
    )(n_valid, logits, tgt2d)

    # Trivial final reduction; padded rows were zeroed / discarded in-kernel.
    return jnp.sum(row_losses) / jnp.float32(n)


def _reference(output, target, alpha=0.1):
    c = output.shape[-1]
    log_p = jax.nn.log_softmax(output.astype(jnp.float32), axis=-1)
    one_hot = jax.nn.one_hot(target, c, dtype=jnp.float32)
    smooth = (1.0 - alpha) * one_hot + alpha / c
    return -(smooth * log_p).sum(-1).mean()


if __name__ == "__main__":
    key = jax.random.PRNGKey(0)
    k1, k2, k3, k4, k5, k6 = jax.random.split(key, 6)
    alpha = 0.1

    # Case 1: small, non-tile-aligned batch; single class tile (C=128).
    n, c = 50, 128
    logits = jax.random.normal(k1, (n, c), dtype=jnp.float32)
    target = jax.random.randint(k2, (n,), 0, c)
    loss = jax.block_until_ready(
        smooth_cross_entropy_loss(logits, target, alpha=alpha, block_rows=16))
    ref = _reference(logits, target, alpha)
    assert loss.shape == (), loss.shape
    assert jnp.allclose(loss, ref, atol=1e-4, rtol=1e-4), (loss, ref)

    # Case 2: class-tiled online-logsumexp path (3 class tiles, ragged last one).
    n2, c2 = 24, 320
    logits2 = jax.random.normal(k3, (n2, c2), dtype=jnp.float32)
    target2 = jax.random.randint(k4, (n2,), 0, c2)
    loss2 = jax.block_until_ready(
        smooth_cross_entropy_loss(logits2, target2, alpha=alpha, block_classes=128))
    ref2 = _reference(logits2, target2, alpha)
    assert jnp.allclose(loss2, ref2, atol=1e-4, rtol=1e-4), (loss2, ref2)

    # Case 3: bf16 logits streamed at 2 B/elem (no wrapper upcast), ragged rows.
    n3, c3 = 40, 256
    logits3 = jax.random.normal(k5, (n3, c3), dtype=jnp.float32).astype(jnp.bfloat16)
    target3 = jax.random.randint(k6, (n3,), 0, c3)
    loss3 = jax.block_until_ready(
        smooth_cross_entropy_loss(logits3, target3, alpha=alpha))
    ref3 = _reference(logits3, target3, alpha)
    assert jnp.allclose(loss3, ref3, atol=2e-3, rtol=2e-3), (loss3, ref3)

    print("KERNEL_OK")
</pallas_src>

<mosaic_0001>
module attributes {stable_mosaic.version = 11 : i64} {
  func.func @_smooth_ce_kernel(%arg0: i32, %arg1: i32, %arg2: memref<1xi32, #tpu.memory_space<smem>>, %arg3: memref<16x128xf32, #tpu.memory_space<vmem>>, %arg4: memref<16x1xi32, #tpu.memory_space<vmem>>, %arg5: memref<16x1xf32, #tpu.memory_space<vmem>>, %arg6: memref<16x1xf32, #tpu.memory_space<vmem>>, %arg7: memref<16x1xf32, #tpu.memory_space<vmem>>, %arg8: memref<16x1xf32, #tpu.memory_space<vmem>>, %arg9: memref<16x1xf32, #tpu.memory_space<vmem>>) attributes {dimension_semantics = [#tpu.dimension_semantics<parallel>, #tpu.dimension_semantics<arbitrary>], iteration_bounds = array<i64: 4, 1>, scalar_prefetch = 1 : i64, scratch_operands = 4 : i64, tpu.core_type = #tpu.core_type<tc>, window_params = [{transform_indices = @transform_0, window_bounds = array<i64: 16, 128>}, {transform_indices = @transform_1, window_bounds = array<i64: 16, 1>}, {transform_indices = @transform_2, window_bounds = array<i64: 16, 1>}]} {
    %c0_i32 = arith.constant 0 : i32
    %0 = arith.cmpi eq, %arg1, %c0_i32 : i32
    %1 = arith.extui %0 : i1 to i32
    %c0_i32_0 = arith.constant 0 : i32
    %2 = arith.cmpi ne, %1, %c0_i32_0 : i32
    scf.if %2 {
      %cst_30 = arith.constant 0xFF800000 : f32
      %50 = vector.broadcast %cst_30 : f32 to vector<16x1xf32>
      %c0_31 = arith.constant 0 : index
      %c0_32 = arith.constant 0 : index
      %51 = vector.load %arg6[%c0_31, %c0_32] : memref<16x1xf32, #tpu.memory_space<vmem>>, vector<16x1xf32>
      tpu.vector_store %arg6[%c0_31, %c0_32], %50 {strides = array<i32>} : memref<16x1xf32, #tpu.memory_space<vmem>>, vector<16x1xf32>,
      %cst_33 = arith.constant 0.000000e+00 : f32
      %52 = vector.broadcast %cst_33 : f32 to vector<16x1xf32>
      %c0_34 = arith.constant 0 : index
      %c0_35 = arith.constant 0 : index
      %53 = vector.load %arg7[%c0_34, %c0_35] : memref<16x1xf32, #tpu.memory_space<vmem>>, vector<16x1xf32>
      tpu.vector_store %arg7[%c0_34, %c0_35], %52 {strides = array<i32>} : memref<16x1xf32, #tpu.memory_space<vmem>>, vector<16x1xf32>,
      %cst_36 = arith.constant 0.000000e+00 : f32
      %54 = vector.broadcast %cst_36 : f32 to vector<16x1xf32>
      %c0_37 = arith.constant 0 : index
      %c0_38 = arith.constant 0 : index
      %55 = vector.load %arg8[%c0_37, %c0_38] : memref<16x1xf32, #tpu.memory_space<vmem>>, vector<16x1xf32>
      tpu.vector_store %arg8[%c0_37, %c0_38], %54 {strides = array<i32>} : memref<16x1xf32, #tpu.memory_space<vmem>>, vector<16x1xf32>,
      %cst_39 = arith.constant 0.000000e+00 : f32
      %56 = vector.broadcast %cst_39 : f32 to vector<16x1xf32>
      %c0_40 = arith.constant 0 : index
      %c0_41 = arith.constant 0 : index
      %57 = vector.load %arg9[%c0_40, %c0_41] : memref<16x1xf32, #tpu.memory_space<vmem>>, vector<16x1xf32>
      tpu.vector_store %arg9[%c0_40, %c0_41], %56 {strides = array<i32>} : memref<16x1xf32, #tpu.memory_space<vmem>>, vector<16x1xf32>,
    } else {
    }
    %c0 = arith.constant 0 : index
    %c0_1 = arith.constant 0 : index
    %3 = vector.load %arg3[%c0, %c0_1] : memref<16x128xf32, #tpu.memory_space<vmem>>, vector<16x128xf32>
    %c0_2 = arith.constant 0 : index
    %c0_3 = arith.constant 0 : index
    %4 = vector.load %arg4[%c0_2, %c0_3] : memref<16x1xi32, #tpu.memory_space<vmem>>, vector<16x1xi32>
    %c128_i32 = arith.constant 128 : i32
    %5 = arith.muli %arg1, %c128_i32 : i32
    %6 = tpu.iota {dimensions = array<i32: 1>} : vector<16x128xi32>
    %7 = vector.broadcast %5 : i32 to vector<16x128xi32>
    %8 = arith.addi %7, %6 : vector<16x128xi32>
    %c128_i32_4 = arith.constant 128 : i32
    %9 = vector.broadcast %c128_i32_4 : i32 to vector<16x128xi32>
    %10 = arith.cmpi slt, %8, %9 : vector<16x128xi32>
    %c0_5 = arith.constant 0 : index
    %c0_6 = arith.constant 0 : index
    %11 = vector.load %arg6[%c0_5, %c0_6] : memref<16x1xf32, #tpu.memory_space<vmem>>, vector<16x1xf32>
    %cst = arith.constant 0xFF800000 : f32
    %12 = vector.broadcast %cst : f32 to vector<16x128xf32>
    %13 = arith.select %10, %3, %12 : vector<16x128xi1>, vector<16x128xf32>
    %cst_7 = arith.constant dense<0xFF800000> : vector<16xf32>
    %14 = vector.multi_reduction <maximumf>, %13, %cst_7 [1] : vector<16x128xf32> to vector<16xf32>
    %15 = vector.shape_cast %14 : vector<16xf32> to vector<16x1xf32>
    %16 = arith.maximumf %11, %15 : vector<16x1xf32>
    %17 = vector.broadcast %16 : vector<16x1xf32> to vector<16x128xf32>
    %18 = arith.subf %3, %17 : vector<16x128xf32>
    %19 = math.exp %18 : vector<16x128xf32>
    %cst_8 = arith.constant 0.000000e+00 : f32
    %20 = vector.broadcast %cst_8 : f32 to vector<16x128xf32>
    %21 = arith.select %10, %19, %20 : vector<16x128xi1>, vector<16x128xf32>
    %c0_9 = arith.constant 0 : index
    %c0_10 = arith.constant 0 : index
    %22 = vector.load %arg7[%c0_9, %c0_10] : memref<16x1xf32, #tpu.memory_space<vmem>>, vector<16x1xf32>
    %23 = arith.subf %11, %16 : vector<16x1xf32>
    %24 = math.exp %23 : vector<16x1xf32>
    %25 = arith.mulf %22, %24 : vector<16x1xf32>
    %cst_11 = arith.constant dense<0.000000e+00> : vector<16xf32>
    %26 = vector.multi_reduction <add>, %21, %cst_11 [1] : vector<16x128xf32> to vector<16xf32>
    %27 = vector.shape_cast %26 : vector<16xf32> to vector<16x1xf32>
    %28 = arith.addf %25, %27 : vector<16x1xf32>
    %c0_12 = arith.constant 0 : index
    %c0_13 = arith.constant 0 : index
    %29 = vector.load %arg7[%c0_12, %c0_13] : memref<16x1xf32, #tpu.memory_space<vmem>>, vector<16x1xf32>
    tpu.vector_store %arg7[%c0_12, %c0_13], %28 {strides = array<i32>} : memref<16x1xf32, #tpu.memory_space<vmem>>, vector<16x1xf32>,
    %c0_14 = arith.constant 0 : index
    %c0_15 = arith.constant 0 : index
    %30 = vector.load %arg6[%c0_14, %c0_15] : memref<16x1xf32, #tpu.memory_space<vmem>>, vector<16x1xf32>
    tpu.vector_store %arg6[%c0_14, %c0_15], %16 {strides = array<i32>} : memref<16x1xf32, #tpu.memory_space<vmem>>, vector<16x1xf32>,
    %c0_16 = arith.constant 0 : index
    %c0_17 = arith.constant 0 : index
    %31 = vector.load %arg8[%c0_16, %c0_17] : memref<16x1xf32, #tpu.memory_space<vmem>>, vector<16x1xf32>
    %32 = vector.broadcast %4 : vector<16x1xi32> to vector<16x128xi32>
    %33 = arith.cmpi eq, %8, %32 : vector<16x128xi32>
    %cst_18 = arith.constant 0.000000e+00 : f32
    %34 = vector.broadcast %cst_18 : f32 to vector<16x128xf32>
    %35 = arith.select %33, %3, %34 : vector<16x128xi1>, vector<16x128xf32>
    %cst_19 = arith.constant dense<0.000000e+00> : vector<16xf32>
    %36 = vector.multi_reduction <add>, %35, %cst_19 [1] : vector<16x128xf32> to vector<16xf32>
    %37 = vector.shape_cast %36 : vector<16xf32> to vector<16x1xf32>
    %38 = arith.addf %31, %37 : vector<16x1xf32>
    %c0_20 = arith.constant 0 : index
    %c0_21 = arith.constant 0 : index
    %39 = vector.load %arg8[%c0_20, %c0_21] : memref<16x1xf32, #tpu.memory_space<vmem>>, vector<16x1xf32>
    tpu.vector_store %arg8[%c0_20, %c0_21], %38 {strides = array<i32>} : memref<16x1xf32, #tpu.memory_space<vmem>>, vector<16x1xf32>,
    %c0_22 = arith.constant 0 : index
    %c0_23 = arith.constant 0 : index
    %40 = vector.load %arg9[%c0_22, %c0_23] : memref<16x1xf32, #tpu.memory_space<vmem>>, vector<16x1xf32>
    %cst_24 = arith.constant 0.000000e+00 : f32
    %41 = vector.broadcast %cst_24 : f32 to vector<16x128xf32>
    %42 = arith.select %10, %3, %41 : vector<16x128xi1>, vector<16x128xf32>
    %cst_25 = arith.constant dense<0.000000e+00> : vector<16xf32>
    %43 = vector.multi_reduction <add>, %42, %cst_25 [1] : vector<16x128xf32> to vector<16xf32>
    %44 = vector.shape_cast %43 : vector<16xf32> to vector<16x1xf32>
    %45 = arith.addf %40, %44 : vector<16x1xf32>
    %c0_26 = arith.constant 0 : index
    %c0_27 = arith.constant 0 : index
    %46 = vector.load %arg9[%c0_26, %c0_27] : memref<16x1xf32, #tpu.memory_space<vmem>>, vector<16x1xf32>
    tpu.vector_store %arg9[%c0_26, %c0_27], %45 {strides = array<i32>} : memref<16x1xf32, #tpu.memory_space<vmem>>, vector<16x1xf32>,
    %c0_i32_28 = arith.constant 0 : i32
    %47 = arith.cmpi eq, %arg1, %c0_i32_28 : i32
    %48 = arith.extui %47 : i1 to i32
    %c0_i32_29 = arith.constant 0 : i32
    %49 = arith.cmpi ne, %48, %c0_i32_29 : i32
    scf.if %49 {
      %c0_30 = arith.constant 0 : index
      %c0_31 = arith.constant 0 : index
      %50 = vector.load %arg6[%c0_30, %c0_31] : memref<16x1xf32, #tpu.memory_space<vmem>>, vector<16x1xf32>
      %c0_32 = arith.constant 0 : index
      %c0_33 = arith.constant 0 : index
      %51 = vector.load %arg7[%c0_32, %c0_33] : memref<16x1xf32, #tpu.memory_space<vmem>>, vector<16x1xf32>
      %52 = math.log %51 : vector<16x1xf32>
      %53 = arith.addf %50, %52 : vector<16x1xf32>
      %c0_34 = arith.constant 0 : index
      %c0_35 = arith.constant 0 : index
      %54 = vector.load %arg8[%c0_34, %c0_35] : memref<16x1xf32, #tpu.memory_space<vmem>>, vector<16x1xf32>
      %55 = arith.subf %54, %53 : vector<16x1xf32>
      %cst_36 = arith.constant 0.899999976 : f32
      %56 = vector.broadcast %cst_36 : f32 to vector<16x1xf32>
      %57 = arith.mulf %56, %55 : vector<16x1xf32>
      %cst_37 = arith.constant 1.000000e-01 : f32
      %cst_38 = arith.constant 1.280000e+02 : f32
      %58 = arith.divf %cst_37, %cst_38 : f32
      %c0_39 = arith.constant 0 : index
      %c0_40 = arith.constant 0 : index
      %59 = vector.load %arg9[%c0_39, %c0_40] : memref<16x1xf32, #tpu.memory_space<vmem>>, vector<16x1xf32>
      %cst_41 = arith.constant 1.280000e+02 : f32
      %60 = vector.broadcast %cst_41 : f32 to vector<16x1xf32>
      %61 = arith.mulf %60, %53 : vector<16x1xf32>
      %62 = arith.subf %59, %61 : vector<16x1xf32>
      %63 = vector.broadcast %58 : f32 to vector<16x1xf32>
      %64 = arith.mulf %63, %62 : vector<16x1xf32>
      %65 = arith.addf %57, %64 : vector<16x1xf32>
      %cst_42 = arith.constant 0.000000e+00 : f32
      %66 = vector.broadcast %cst_42 : f32 to vector<16x1xf32>
      %67 = arith.subf %66, %65 : vector<16x1xf32>
      %c16_i32 = arith.constant 16 : i32
      %68 = arith.muli %arg0, %c16_i32 : i32
      %69 = tpu.iota {dimensions = array<i32: 0>} : vector<16x1xi32>
      %70 = vector.broadcast %68 : i32 to vector<16x1xi32>
      %71 = arith.addi %70, %69 : vector<16x1xi32>
      %c0_43 = arith.constant 0 : index
      %72 = memref.load %arg2[%c0_43] : memref<1xi32, #tpu.memory_space<smem>>
      %73 = vector.broadcast %72 : i32 to vector<16x1xi32>
      %74 = arith.cmpi slt, %71, %73 : vector<16x1xi32>
      %cst_44 = arith.constant 0.000000e+00 : f32
      %75 = vector.broadcast %cst_44 : f32 to vector<16x1xf32>
      %76 = arith.select %74, %67, %75 : vector<16x1xi1>, vector<16x1xf32>
      %c0_45 = arith.constant 0 : index
      %c0_46 = arith.constant 0 : index
      %77 = vector.load %arg5[%c0_45, %c0_46] : memref<16x1xf32, #tpu.memory_space<vmem>>, vector<16x1xf32>
      tpu.vector_store %arg5[%c0_45, %c0_46], %76 {strides = array<i32>} : memref<16x1xf32, #tpu.memory_space<vmem>>, vector<16x1xf32>,
    } else {
    }
    return
  }
  func.func @transform_0(%arg0: i32, %arg1: i32, %arg2: memref<1xi32, #tpu.memory_space<smem>>) -> (i32, i32) {
    %c0_i32 = arith.constant 0 : i32
    return %arg0, %arg1 : i32, i32
  }
  func.func @transform_1(%arg0: i32, %arg1: i32, %arg2: memref<1xi32, #tpu.memory_space<smem>>) -> (i32, i32) {
    %c0_i32 = arith.constant 0 : i32
    %c0_i32_0 = arith.constant 0 : i32
    return %arg0, %c0_i32 : i32, i32
  }
  func.func @transform_2(%arg0: i32, %arg1: i32, %arg2: memref<1xi32, #tpu.memory_space<smem>>) -> (i32, i32) {
    %c0_i32 = arith.constant 0 : i32
    %c0_i32_0 = arith.constant 0 : i32
    return %arg0, %c0_i32 : i32, i32
  }
}

</mosaic_0001>

<bundles_post_ra>
// kernel: tpu_custom_call.1
= control target key start
LH: loop header
LB: loop body
LE: loop exit
PB: predicated region body
PF: predicated region fallthrough
CT: control target
= control target key end

     0   :  { %s1038_s0 = inlined_call_operand.<no memory space> [shape: s32[1], index: 0, kind: input, shape index: {}]   ;;  %s1039_s1 = inlined_call_operand.vmem [shape: f32[50,128], index: 1, kind: input, shape index: {}]   ;;  %s1040_s2 = inlined_call_operand.vmem [shape: s32[50,1], index: 2, kind: input, shape index: {}]   ;;  %s1041_s3 = inlined_call_operand.vmem [shape: f32[50,1], index: 3, kind: output, shape index: {}]  }
   0x1   :  { %8 = sst [smem:[#allocation7]] %s1038_s0 }
   0x2   :  { %s906_s14 = smov 0   ;;  %s908_s15 = smov 0  }
   0x3   :  { %s910_s16 = smov 0   ;;  %s912_s17 = smov 0  }
   0x4   :  { %s914_s18 = smov 0  }
   0x5 LB: > { %s624_s0 = sadd.s32 4294967295, %s846_s18   ;;  %s26_s19 = sadd.s32 1, %s842_s17  ;;  %s846_s18 = sphi %s914_s18, %s14_s18   ;;  %s842_s17 = sphi %s912_s17, %s1046_s17   ;;  %s838_s16 = sphi %s910_s16, %s1045_s16   ;;  %s834_s15 = sphi %s908_s15, %s1044_s15   ;;  %s830_s14 = sphi %s906_s14, %s1043_s14  }
   0x6   : > { %p28_p0 = scmp.ge.s32.totalorder %s26_s19, 4  ;;  %s87_s20 = sadd.s32 1, %s834_s15 }
   0x7   : > { %p97_p1 = scmp.ne.s32.totalorder %s834_s15, %s830_s14  ;;  %p98_p2 = scmp.eq.s32.totalorder %s624_s0, 3 }
   0x8   : > { %s1048_s19 = smov (%p28_p0, %s26_s19), 0  ;;  %p628_p4 = scmp.ge.s32.totalorder %s846_s18, 1 }
   0x9   : > { %p938_p3 = por %p98_p2, %p97_p1  ;;  %s84_s22 = ssub.s32 %s842_s17, %s1048_s19 }
   0xa   : > { %p159_p5 = scmp.lt.s32.totalorder %s846_s18, 5  ;;  %p85_p6 = scmp.eq.s32.totalorder %s84_s22, 0 }
   0xc   : > { %p160_p7 = pnand %p628_p4, %p159_p5 }
   0xd   : > { %s947_s23 = scalar_select %p85_p6, %s834_s15, %s87_s20  }
   0xe   : > { %163 = sbr.rel (%p160_p7) target bundleno = 545 (0x221), region = 28  ;;  %s950_s24 = sshll.u32 (!%p160_p7), %s838_s16, 1  ;;  %vm236_vm0 = vcmask (!%p160_p7), 7168   ;;  %v880_v0 = vmov (!%p160_p7), -inf   ;;  %v881_v3 = vmov (!%p160_p7), 0   ;;  %v882_v4 = vmov (!%p160_p7), 0.0  }
   0xf   : > { %p201_p8 = scmp.lt.s32.totalorder (!%p160_p7), %s950_s24, 6  ;;  %237 = vst.msk [vmem:[#allocation2] sm:$0xff] (!%p160_p7), %vm236_vm0, %v880_v0  ;;  %238 = vst.msk [vmem:[#allocation2 + $0x8] sm:$0xff] (!%p160_p7), %vm236_vm0, %v880_v0  ;;  %762 = vset.pattern.permute.xlu1 (!%p160_p7), %v881_v3  ;;  %763 = vset.pattern.permute.xlu0 (!%p160_p7), %v881_v3  ;;  %v250_v15 = vlaneseq (!%p160_p7)  ;;  %s977_s6 = sld [smem:[#allocation7]] (!%p160_p7) }
  0x10   : > { %239 = vst.msk [vmem:[#allocation3] sm:$0xff] (!%p160_p7), %vm236_vm0, %v882_v4  ;;  %240 = vst.msk [vmem:[#allocation3 + $0x8] sm:$0xff] (!%p160_p7), %vm236_vm0, %v882_v4  ;;  %s634_s7 = sshll.u32 (!%p160_p7), %s838_s16, 4  ;;  %s193_s8 = sand.u32 (!%p160_p7), 1, %s830_s14  }
  0x11   : > { %241 = vst.msk [vmem:[#allocation4] sm:$0xff] (!%p160_p7), %vm236_vm0, %v882_v4  ;;  %242 = vst.msk [vmem:[#allocation4 + $0x8] sm:$0xff] (!%p160_p7), %vm236_vm0, %v882_v4  ;;  %v251_v16 = vand.u32 (!%p160_p7), 127, %v250_v15  ;;  %v369_v61 = vshrl.u32 (!%p160_p7), %v250_v15, 7  ;;  %v371_v63 = vstv (!%p160_p7), %s634_s7  ;;  %s629_s9 = sshll.u32 (!%p160_p7), %s193_s8, 4 }
  0x12   : > { %243 = vst.msk [vmem:[#allocation5] sm:$0xff] (!%p160_p7), %vm236_vm0, %v882_v4  ;;  %244 = vst.msk [vmem:[#allocation5 + $0x8] sm:$0xff] (!%p160_p7), %vm236_vm0, %v882_v4  ;;  %s985_s10 = scalar_lea.vmem (!%p160_p7), [#allocation8], %s629_s9  }
  0x15   : > { %s202_s25 = scalar_select %p201_p8, %s950_s24, 6 }
  0x16   : > { %v255_v6 = vld [vmem:[#allocation2] sm:$0xff]  ;;  %v256_v9 = vld [vmem:[#allocation2 + $0x8] sm:$0xff]  ;;  %s390_s11 = ssub.s32 (%p938_p3), 7, %s950_s24  ;;  %s999_s14 = scalar_lea.vmem (%p938_p3), %s1041_s3, %s634_s7  }
  0x17   : > { %s631_s26 = sshll.u32 %s202_s25, 3  ;;  %v283_v35 = vld [vmem:[#allocation3] sm:$0xff]  ;;  %v284_v39 = vld [vmem:[#allocation3 + $0x8] sm:$0xff]  ;;  %p391_p9 = scmp.lt.s32.totalorder (%p938_p3), %s390_s11, 2 }
  0x18   : > { %s207_s29 = scalar_lea.vmem %s1039_s1, %s631_s26  ;;  %s221_s5 = scalar_lea.vmem %s1040_s2, %s631_s26  ;;  %v304_v29 = vld [vmem:[#allocation4] sm:$0xff]  ;;  %v305_v44 = vld [vmem:[#allocation4 + $0x8] sm:$0xff] }
  0x19   : > { %v245_v1 = vld [vmem:[%s207_s29] sm:$0xff]  ;;  %v246_v2 = vld [vmem:[%s207_s29 + $0x8] sm:$0xff]  ;;  %v324_v48 = vld [vmem:[#allocation5] sm:$0xff] }
  0x1a   : > { %259 = vmax.xlane.f32.xlu0 %v245_v1  ;;  %v247_v5 = vld [vmem:[%s221_s5] sm:$0xff]  ;;  %v248_v14 = vld [vmem:[%s221_s5 + $0x8] sm:$0xff]  ;;  %v325_v52 = vld [vmem:[#allocation5 + $0x8] sm:$0xff] }
  0x1e   : > { %261 = vmax.xlane.f32.xlu0 %v246_v2 }
  0x34   : > { %307 = vperm.xlu0 %763, %v247_v5  }
  0xa7   : > { %v260_v7 = vpop.xlane.xlu0 %259 }
  0xa8   : > { %v263_v8 = vmax.f32 %v255_v6, %v260_v7  ;;  %v372_v7 = vadd.s32 %v371_v63, %v369_v61 }
  0xaa   : > { %v285_v10 = vsub.f32 %v255_v6, %v263_v8  ;;  %302 = vst.msk [vmem:[#allocation2] sm:$0xff] %vm236_vm0, %v263_v8  ;;  %267 = vperm.xlu1 %762, %v263_v8   ;;  %v370_v6 = vadd.s32 8, %v369_v61  ;;  %v375_v8 = vstv %s977_s6 }
  0xab   : > { %v262_v11 = vpop.xlane.xlu0 %261  ;;  %vm376_vm3 = vcmp.lt.s32.totalorder %v372_v7, %v375_v8 }
  0xac   : > { %v264_v12 = vmax.f32 %v256_v9, %v262_v11  ;;  %v287_v32 = vmul.f32 1.442695, %v285_v10 }
  0xae   : > { %v286_v13 = vsub.f32 %v256_v9, %v264_v12  ;;  %303 = vst.msk [vmem:[#allocation2 + $0x8] sm:$0xff] %vm236_vm0, %v264_v12  ;;  %272 = vperm.xlu1 %762, %v264_v12  }
  0xb0   : > { %v289_v33 = vmul.f32 1.442695, %v286_v13 }
  0xb1   : > { %v339_v57 = vld [vmem:[#allocation2] sm:$0xff] }
  0xb2   : > { %310 = vperm.xlu1 %762, %v248_v14  }
  0xb3   : > { %v308_v17 = vpop.permute.xlu0 %307 }
  0xb4   : > { %vm312_vm1 = vcmp.eq.s32.totalorder %v251_v16, %v308_v17  ;;  %v373_v17 = vadd.s32 %v371_v63, %v370_v6 }
  0xb5   : > { %v314_v18 = vsel %vm312_vm1, %v245_v1, 0.0  ;;  %v340_v3 = vld [vmem:[#allocation2 + $0x8] sm:$0xff] }
  0xb6   : > { %316 = vadd.xlane.f32.xlu0 %v314_v18  ;;  %vm377_vm4 = vcmp.lt.s32.totalorder %v373_v17, %v375_v8 }
 0x129   : > { %v268_v19 = vpop.permute.xlu1 %267 }
 0x12a   : > { %v275_v20 = vsub.f32 %v245_v1, %v268_v19 }
 0x12c   : > { %v277_v21 = vmul.f32 1.442695, %v275_v20 }
 0x12d   : > { %v273_v22 = vpop.permute.xlu1 %272 }
 0x12e   : > { %764 = vpow2.f32 %v277_v21  ;;  %v276_v23 = vsub.f32 %v246_v2, %v273_v22 }
 0x130   : > { %v279_v24 = vmul.f32 1.442695, %v276_v23 }
 0x131   : > { %v311_v26 = vpop.permute.xlu1 %310 }
 0x132   : > { %766 = vpow2.f32 %v279_v24  ;;  %vm313_vm2 = vcmp.eq.s32.totalorder %v251_v16, %v311_v26 }
 0x133   : > { %v315_v28 = vsel %vm313_vm2, %v246_v2, 0.0  ;;  %768 = vpow2.f32 %v287_v32 }
 0x134   : > { %770 = vpow2.f32 %v289_v33 }
 0x138   : > { %v765_v25 = vpop.eup %764 }
 0x139   : > { %293 = vadd.xlane.f32.xlu1 %v765_v25 }
 0x13c   : > { %v767_v27 = vpop.eup %766 }
 0x13d   : > { %295 = vadd.xlane.f32.xlu1 %v767_v27  ;;  %v769_v34 = vpop.eup %768 }
 0x13e   : > { %v291_v36 = vmul.f32 %v769_v34, %v283_v35  ;;  %v771_v37 = vpop.eup %770 }
 0x13f   : > { %v292_v41 = vmul.f32 %v771_v37, %v284_v39 }
 0x141   : > { %318 = vadd.xlane.f32.xlu1 %v315_v28 }
 0x143   : > { %v317_v30 = vpop.xlane.xlu0 %316 }
 0x144   : > { %v320_v31 = vadd.f32 %v317_v30, %v304_v29 }
 0x145   : > { %328 = vadd.xlane.f32.xlu1 %v245_v1 }
 0x146   : > { %322 = vst.msk [vmem:[#allocation4] sm:$0xff] %vm236_vm0, %v320_v31 }
 0x149   : > { %330 = vadd.xlane.f32.xlu1 %v246_v2 }
 0x14d   : > { %v349_v58 = vld [vmem:[#allocation4] sm:$0xff] }
 0x1c6   : > { %v294_v38 = vpop.xlane.xlu1 %293 }
 0x1c7   : > { %v297_v40 = vadd.f32 %v294_v38, %v291_v36 }
 0x1c9   : > { %300 = vst.msk [vmem:[#allocation3] sm:$0xff] %vm236_vm0, %v297_v40 }
 0x1ca   : > { %v296_v42 = vpop.xlane.xlu1 %295 }
 0x1cb   : > { %v298_v43 = vadd.f32 %v296_v42, %v292_v41 }
 0x1cd   : > { %301 = vst.msk [vmem:[#allocation3 + $0x8] sm:$0xff] %vm236_vm0, %v298_v43 }
 0x1ce   : > { %v319_v45 = vpop.xlane.xlu1 %318 }
 0x1cf   : > { %v321_v46 = vadd.f32 %v319_v45, %v305_v44 }
 0x1d0   : > { %v341_v47 = vld [vmem:[#allocation3] sm:$0xff] }
 0x1d1   : > { %772 = vlog2.f32 %v341_v47  ;;  %323 = vst.msk [vmem:[#allocation4 + $0x8] sm:$0xff] %vm236_vm0, %v321_v46 }
 0x1d2   : > { %v329_v49 = vpop.xlane.xlu1 %328 }
 0x1d3   : > { %v332_v50 = vadd.f32 %v329_v49, %v324_v48 }
 0x1d4   : > { %v342_v51 = vld [vmem:[#allocation3 + $0x8] sm:$0xff] }
 0x1d5   : > { %774 = vlog2.f32 %v342_v51  ;;  %334 = vst.msk [vmem:[#allocation5] sm:$0xff] %vm236_vm0, %v332_v50 }
 0x1d6   : > { %v331_v53 = vpop.xlane.xlu1 %330 }
 0x1d7   : > { %v333_v54 = vadd.f32 %v331_v53, %v325_v52 }
 0x1d8   : > { %v350_v9 = vld [vmem:[#allocation4 + $0x8] sm:$0xff] }
 0x1d9   : > { %335 = vst.msk [vmem:[#allocation5 + $0x8] sm:$0xff] %vm236_vm0, %v333_v54 }
 0x1db   : > { %v773_v55 = vpop.eup %772 }
 0x1dc   : > { %v344_v56 = vmul.f32 0.6931472, %v773_v55  ;;  %v355_v62 = vld [vmem:[#allocation5] sm:$0xff] }
 0x1de   : > { %v347_v59 = vadd.f32 %v344_v56, %v339_v57 }
 0x1df   : > { %v775_v60 = vpop.eup %774 }
 0x1e0   : > { %v346_v0 = vmul.f32 0.6931472, %v775_v60  ;;  %v351_v1 = vsub.f32 %v349_v58, %v347_v59  ;;  %v357_v2 = vmul.f32 128.0, %v347_v59  ;;  %v356_v10 = vld [vmem:[#allocation5 + $0x8] sm:$0xff] }
 0x1e2   : > { %v348_v4 = vadd.f32 %v346_v0, %v340_v3  ;;  %v359_v5 = vsub.f32 %v355_v62, %v357_v2  ;;  %v353_v12 = vmul.f32 0.9, %v351_v1 }
 0x1e4   : > { %v352_v11 = vsub.f32 %v350_v9, %v348_v4  ;;  %v361_v13 = vmul.f32 0.00078125, %v359_v5  ;;  %v358_v14 = vmul.f32 128.0, %v348_v4 }
 0x1e6   : > { %v363_v15 = vadd.f32 %v361_v13, %v353_v12  ;;  %v360_v16 = vsub.f32 %v356_v10, %v358_v14  ;;  %v354_v18 = vmul.f32 0.9, %v352_v11 }
 0x1e8   : > { %v365_v19 = vsub.f32 0.0, %v363_v15  ;;  %v362_v20 = vmul.f32 0.00078125, %v360_v16 }
 0x1e9   : > { %388 = sbr.rel (!%p938_p3) target bundleno = 545 (0x221), region = 40 }
 0x1ea   : > { %v378_v21 = vsel %vm376_vm3, %v365_v19, 0.0  ;;  %v364_v22 = vadd.f32 %v362_v20, %v354_v18 }
 0x1eb   : > { %380 = vst.msk [vmem:[%s985_s10] sm:$0xff] %vm236_vm0, %v378_v21 }
 0x1ec   : > { %v366_v23 = vsub.f32 0.0, %v364_v22 }
 0x1ee   : > { %v379_v24 = vsel %vm377_vm4, %v366_v23, 0.0 }
 0x1ef   : > { %381 = vst.msk [vmem:[%s985_s10 + $0x8] sm:$0xff] %vm236_vm0, %v379_v24 }
 0x1f0   : > { %s1050_s11 = smov (!%p391_p9, %s390_s11), 2 }
 0x1f1   : > { %s637_s0 = sshll.u32 %s1050_s11, 7 }
 0x1f2   : > { %p640_p10 = scmp.eq.s32.totalorder %s637_s0, 0 }
 0x1f3   : > { %s1005_s20 = sshrl.u32 (!%p640_p10), %s1050_s11, 1 }
 0x1f4   : > { %399 = sbr.rel (%p640_p10) target bundleno = 545 (0x221), region = 44  ;;  %p641_p11 = scmp.le.s32.totalorder (!%p640_p10), %s1005_s20, 0 }
 0x1fb   : > { %566 = sbr.rel (%p641_p11) target bundleno = 524 (0x20c), region = 123  ;;  %s848_s16 = smov (!%p641_p11), %s999_s14  }
 0x1fc   : > { %s852_s21 = smov (!%p641_p11), %s985_s10   ;;  %s856_s22 = smov (!%p641_p11), 0  }
 0x1fd   : > { %s860_s24 = smov (!%p641_p11), 0  }
 0x202 LB: >> { %v463_v25 = vld [vmem:[%s854_s21] sm:$0xff]  ;;  %v465_v26 = vld [vmem:[%s854_s21 + $0x8] sm:$0xff]  ;;  %s467_s25 = sadd.s32 1, %s858_s22  ;;  %s457_s24 = sadd.s32 1, %s862_s24   ;;  %s862_s24 = sphi %s860_s24, %s457_s24   ;;  %s858_s22 = sphi %s856_s22, %s857_s22   ;;  %s854_s21 = sphi %s852_s21, %s472_s21   ;;  %s850_s16 = sphi %s848_s16, %s473_s16  }
 0x203   : >> { %464 = vst [vmem:[%s850_s16] sm:$0xff] %v463_v25  ;;  %466 = vst [vmem:[%s850_s16 + $0x8] sm:$0xff] %v465_v26  ;;  %p468_p12 = scmp.ge.s32.totalorder %s467_s25, %s1005_s20  ;;  %p456_p13 = scmp.ge.s32.totalorder %s457_s24, %s1005_s20 }
 0x205   : >> { %s1052_s25 = smov (%p468_p12, %s467_s25), 0  ;;  %459 = sbr.rel (!%p456_p13) target bundleno = 514 (0x202), region = 129 }
 0x206   : >> { %s642_s26 = sshll.u32 %s1052_s25, 4  ;;  %s857_s22 = smov %s1052_s25  }
 0x207   : >> { %s472_s21 = scalar_lea.vmem %s985_s10, %s642_s26 [#allocation8]   ;;  %s473_s16 = scalar_lea.vmem %s999_s14, %s642_s26  }
 0x20c PF: > { %s1015_s27 = sand.u32 1, %s1050_s11   ;;  %s653_s28 = sshll.u32 %s1005_s20, 4 }
 0x20d   : > { %s478_s29 = scalar_lea.vmem %s985_s10, %s653_s28 [#allocation8]   ;;  %s480_s30 = scalar_lea.vmem %s999_s14, %s653_s28  }
 0x20e   : > { %p647_p0 = scmp.le.s32.totalorder %s1015_s27, 0 }
 0x20f   : > { %s864_s4 = smov (!%p647_p0), %s480_s30   ;;  %s868_s5 = smov (!%p647_p0), %s478_s29  }
 0x210   : > { %580 = sbr.rel (%p647_p0) target bundleno = 545 (0x221), region = 134  ;;  %s872_s6 = smov (!%p647_p0), 0  }
 0x211   : > { %s876_s7 = smov (!%p647_p0), 0  }
 0x217 LB: >> { %v490_v27 = vld [vmem:[%s870_s5] sm:$0xff]  ;;  %s492_s8 = sadd.s32 1, %s874_s6  ;;  %s484_s7 = sadd.s32 1, %s878_s7   ;;  %s878_s7 = sphi %s876_s7, %s484_s7   ;;  %s874_s6 = sphi %s872_s6, %s873_s6   ;;  %s870_s5 = sphi %s868_s5, %s497_s5   ;;  %s866_s4 = sphi %s864_s4, %s498_s4  }
 0x218   : >> { %491 = vst [vmem:[%s866_s4] sm:$0xff] %v490_v27  ;;  %p493_p1 = scmp.ge.s32.totalorder %s492_s8, %s1015_s27  ;;  %p483_p2 = scmp.ge.s32.totalorder %s484_s7, %s1015_s27 }
 0x21a   : >> { %s1054_s8 = smov (%p493_p1, %s492_s8), 0  ;;  %486 = sbr.rel (!%p483_p2) target bundleno = 535 (0x217), region = 140 }
 0x21b   : >> { %s648_s9 = sshll.u32 %s1054_s8, 3  ;;  %s873_s6 = smov %s1054_s8  }
 0x21c   : >> { %s497_s5 = scalar_lea.vmem %s478_s29, %s648_s9 [#allocation8]   ;;  %s498_s4 = scalar_lea.vmem %s480_s30, %s648_s9  }
 0x221 PF: > { %s14_s18 = sadd.s32 1, %s846_s18   ;;  %s1043_s14 = smov %s834_s15 }
 0x222   : > { %p11_p3 = scmp.ge.s32.totalorder %s14_s18, 6   ;;  %s1044_s15 = smov %s947_s23 }
 0x223   : > { %s1045_s16 = smov %s842_s17  ;;  %s1046_s17 = smov %s1048_s19 }
 0x224   :  { %13 = sbr.rel (!%p11_p3) target bundleno = 5 (0x5), region = 151 }

</bundles_post_ra>
